<compile_context>
chip_gen: v6e
topology: v6e:2x2x1
jax: 0.10.0
libtpu: 0.0.40
codegen_flags: <defaults>
</compile_context>

<pallas_src>
import jax
import jax.numpy as jnp
from jax.experimental import pallas as pl
from jax.experimental.pallas import tpu as pltpu


def _permute_flatten_kernel(x_ref, o_ref):
    # Per grid step (one image): x_ref is (C, HW), o_ref is (HW, C).
    # Single 2-D XLU transpose; no intermediate relayout.
    o_ref[...] = x_ref[...].T


def linear_conv_forward(x):
    """x: (N, C, H, W) -> (N, H*W, C), matching LinearConv.forward."""
    n, c, h, w = x.shape
    hw = h * w
    x2 = x.reshape(n, c, hw)  # contiguous merge of H,W: free in XLA
    bytes_accessed = 2 * n * c * hw * x.dtype.itemsize  # read + write
    return pl.pallas_call(
        _permute_flatten_kernel,
        out_shape=jax.ShapeDtypeStruct((n, hw, c), x.dtype),
        grid=(n,),
        in_specs=[pl.BlockSpec((None, c, hw), lambda i: (i, 0, 0))],
        out_specs=pl.BlockSpec((None, hw, c), lambda i: (i, 0, 0)),
        compiler_params=pltpu.CompilerParams(
            dimension_semantics=("parallel",)),
        cost_estimate=pl.CostEstimate(
            flops=0, transcendentals=0, bytes_accessed=bytes_accessed),
    )(x2)


def init_params(key):
    # nn.Linear(48, 48): weight (48, 48), bias (48,). Deterministic init.
    # TODO(synk): linear_conv parameters are unused in forward(); kept only
    # for structural parity with the PyTorch module.
    kw, kb = jax.random.split(key)
    weight = jax.random.normal(kw, (48, 48), jnp.float32) * 0.02
    bias = jax.random.normal(kb, (48,), jnp.float32) * 0.02
    return {"linear_conv": {"weight": weight, "bias": bias}}


if __name__ == "__main__":
    key = jax.random.PRNGKey(0)
    k_params, k_x = jax.random.split(key)

    params = init_params(k_params)  # unused in forward, as in the reference

    # Small shapes consistent with the module: C=48 (to match Linear(48,48)),
    # batch=2, spatial=8x8.
    N, C, H, W = 2, 48, 8, 8
    x = jax.random.normal(k_x, (N, C, H, W), jnp.float32)

    out = jax.block_until_ready(linear_conv_forward(x))

    # Reference check (plain JAX mirror of the PyTorch forward).
    ref = jnp.transpose(x, (0, 2, 3, 1)).reshape(N, H * W, C)
    assert out.shape == (N, H * W, C), out.shape
    assert out.dtype == x.dtype
    assert jnp.allclose(out, ref), "mismatch vs reference permute+flatten"

    print("KERNEL_OK")
</pallas_src>

<mosaic_0001>
module attributes {stable_mosaic.version = 11 : i64} {
  func.func @_permute_flatten_kernel(%arg0: i32, %arg1: memref<1x48x64xf32, #tpu.memory_space<vmem>>, %arg2: memref<1x64x48xf32, #tpu.memory_space<vmem>>) attributes {dimension_semantics = [#tpu.dimension_semantics<parallel>], iteration_bounds = array<i64: 2>, scalar_prefetch = 0 : i64, scratch_operands = 0 : i64, tpu.core_type = #tpu.core_type<tc>, window_params = [{transform_indices = @transform_0, window_bounds = array<i64: 1, 48, 64>}, {transform_indices = @transform_1, window_bounds = array<i64: 1, 64, 48>}]} {
    %c0 = arith.constant 0 : index
    %c0_0 = arith.constant 0 : index
    %c0_1 = arith.constant 0 : index
    %0 = vector.load %arg1[%c0, %c0_0, %c0_1] : memref<1x48x64xf32, #tpu.memory_space<vmem>>, vector<1x48x64xf32>
    %1 = vector.shape_cast %0 : vector<1x48x64xf32> to vector<48x64xf32>
    %2 = tpu.transpose %1, [1, 0] : vector<48x64xf32> -> vector<64x48xf32>
    %c0_2 = arith.constant 0 : index
    %c0_3 = arith.constant 0 : index
    %c0_4 = arith.constant 0 : index
    %3 = vector.load %arg2[%c0_2, %c0_3, %c0_4] : memref<1x64x48xf32, #tpu.memory_space<vmem>>, vector<1x64x48xf32>
    %4 = vector.shape_cast %3 : vector<1x64x48xf32> to vector<64x48xf32>
    %5 = vector.shape_cast %2 : vector<64x48xf32> to vector<1x64x48xf32>
    tpu.vector_store %arg2[%c0_2, %c0_3, %c0_4], %5 {strides = array<i32>} : memref<1x64x48xf32, #tpu.memory_space<vmem>>, vector<1x64x48xf32>,
    return
  }
  func.func @transform_0(%arg0: i32) -> (i32, i32, i32) {
    %c0_i32 = arith.constant 0 : i32
    %c0_i32_0 = arith.constant 0 : i32
    %c0_i32_1 = arith.constant 0 : i32
    return %arg0, %c0_i32, %c0_i32_0 : i32, i32, i32
  }
  func.func @transform_1(%arg0: i32) -> (i32, i32, i32) {
    %c0_i32 = arith.constant 0 : i32
    %c0_i32_0 = arith.constant 0 : i32
    %c0_i32_1 = arith.constant 0 : i32
    return %arg0, %c0_i32, %c0_i32_0 : i32, i32, i32
  }
}

</mosaic_0001>

<bundles_post_ra>
// kernel: tpu_custom_call.1
= control target key start
LH: loop header
LB: loop body
LE: loop exit
PB: predicated region body
PF: predicated region fallthrough
CT: control target
= control target key end

     0   :  { %6 = vsyncpa [#allocation3], 0  ;;  %s492_s0 = inlined_call_operand.hbm [shape: f32[2,48,64], index: 0, kind: input, shape index: {}]   ;;  %s493_s1 = inlined_call_operand.vmem [shape: f32[2,64,48], index: 1, kind: output, shape index: {}]  }
   0x1   :  { %8 = vsyncpa [#allocation3 + $0x1], 0  ;;  %s383_s6 = smov 0   ;;  %s385_s7 = smov 0  }
   0x2   :  { %s387_s8 = smov 0   ;;  %s389_s9 = smov 0  }
   0x3 LB: > { %s402_s10 = sadd.s32 4294967295, %s368_s9   ;;  %s405_s11 = sadd.s32 1, %s368_s9   ;;  %s368_s9 = sphi %s389_s9, %s502_s9   ;;  %s364_s8 = sphi %s387_s8, %s501_s8   ;;  %s360_s7 = sphi %s385_s7, %s500_s7   ;;  %s356_s6 = sphi %s383_s6, %s499_s6  }
   0x4   : > { %s18_s12 = ssub.s32 %s368_s9, %s405_s11  ;;  %s21_s13 = sadd.s32 1, %s364_s8 }
   0x5   : > { %p19_p0 = scmp.eq.s32.totalorder %s18_s12, 0  ;;  %p28_p1 = scmp.ne.s32.totalorder %s364_s8, %s360_s7 }
   0x6   : > { %p29_p2 = scmp.eq.s32.totalorder %s368_s9, 0  ;;  %p34_p3 = scmp.ne.s32.totalorder %s360_s7, %s356_s6 }
   0x7   : > { %s415_s14 = scalar_select %p19_p0, %s364_s8, %s21_s13  }
   0x8   : > { %p30_p4 = por %p29_p2, %p28_p1  ;;  %p35_p5 = scmp.eq.s32.totalorder %s402_s10, 0 }
   0x9   : > { %p270_p6 = scmp.lt.s32.totalorder %s368_s9, 2  ;;  %s84_s16 = sand.u32 1, %s364_s8  }
   0xa   : > { %p419_p7 = por %p35_p5, %p34_p3  ;;  %s261_s17 = smul.u32 48, %s84_s16 }
   0xb   : > { %s262_s18 = smul.u32 768, %s368_s9  ;;  %p425_p8 = pnand %p270_p6, %p30_p4 }
   0xc   : > { %s495_s15 = scalar_select %p419_p7, 1, 0 }
   0xd   : > { %s432_s22 = scalar_lea.hbm %s492_s0, %s262_s18  ;;  %s88_s23 = scalar_lea.vmem [#allocation2], %s261_s17 }
   0xe   : > { %s95_s24 = sshll.u32 %s88_s23, 4  ;;  %s437_s25 = scalar_lea.sflag [#allocation3], %s84_s16  ;;  %s434_s24 = int_to_ptr.vmem [resolvable:$true] %s95_s24 }
   0xf   : > { %s306_s26 = scalar_lea.hbm %s432_s22, 768  ;;  %p308_p11 = pneg %p425_p8 }
  0x10   : > { %p307_p10 = scmp.ne.s32.totalorder %s432_s22, %s306_s26  ;;  %s311_s29 = scalar_lea.hbm %s492_s0, 1536 }
  0x11   : > { %p312_p0 = scmp.lt.s32.totalorder %s432_s22, %s492_s0  ;;  %p313_p1 = scmp.lt.s32.totalorder %s311_s29, %s306_s26 }
  0x12   : > { %p309_p12 = pnand %p308_p11, %p307_p10 }
  0x13   : > { %p314_p2 = por %p313_p1, %p312_p0 }
  0x14   : > { %p310_p13 = pneg %p309_p12 }
  0x16   : > { %p315_p3 = pnand %p314_p2, %p310_p13 }
  0x18   : > { %318 = shalt.err (!%p315_p3)
}
  0x19   : > { %s319_s3 = scalar_lea.vmem %s434_s24, 768  ;;  %s370_s4 = smov [#allocation2]  }
  0x1a   : > { %p320_p4 = scmp.ne.s32.totalorder %s434_s24, %s319_s3  ;;  %s324_s5 = sshll.u32 %s370_s4, 4  ;;  %s325_s5 = int_to_ptr.vmem [resolvable:$false] %s324_s5 }
  0x1b   : > { %s326_s6 = scalar_lea.vmem %s325_s5, 1536  ;;  %p327_p10 = scmp.lt.s32.totalorder %s434_s24, %s325_s5 }
  0x1c   : > { %p322_p5 = pnand %p320_p4, %p308_p11  ;;  %p328_p12 = scmp.lt.s32.totalorder %s326_s6, %s319_s3 }
  0x1e   : > { %p323_p6 = pneg %p322_p5  ;;  %p329_p9 = por %p328_p12, %p327_p10 }
  0x20   : > { %p330_p7 = pnand %p329_p9, %p323_p6 }
  0x22   : > { %333 = shalt.err (!%p330_p7)
}
  0x23   : > { %s371_s12 = smov 128   ;;  %s372_s13 = smov 8  }
  0x24   : > { %269 = dma.hbm_to_vmem [thread:$0]  (!%p425_p8), %s432_s22, 768, %s434_s24, %s437_s25, %s371_s12, %s371_s12, %s372_s13  }
  0x25   : > { %p103_p11 = scmp.lt.s32.totalorder %s368_s9, 3  ;;  %p497_p13 = scmp.ge.s32.totalorder %s368_s9, 1 }
  0x27   : > { %p104_p0 = pnand %p497_p13, %p103_p11 }
  0x28   : > { %s109_s16 = sand.u32 (!%p104_p0), 1, %s360_s7   ;;  %p498_p7 = scmp.ne.s32.totalorder (!%p104_p0), %s495_s15, 0 }
  0x29   : > { %107 = sbr.rel (%p104_p0) target bundleno = 202 (0xca), region = 24  ;;  %s110_s18 = scalar_lea.sflag (!%p104_p0), [#allocation3], %s109_s16 }
  0x2a   : > { %s263_s17 = smul.u32 (!%p104_p0), 48, %s109_s16 }
  0x2c   : > { %s113_s20 = scalar_lea.vmem (!%p104_p0), [#allocation2], %s263_s17 }
  0x2e   : > { %351 = dma.done.wait (%p498_p7), %s110_s18, 768  }
  0x2f   : > { %353 = vsyncadd (%p498_p7), %s110_s18, 4294966528  ;;  %v137_v0 = vld [vmem:[%s113_s20] sm:$0xff]  ;;  %v138_v1 = vld [vmem:[%s113_s20 + $0x8] sm:$0xff]  ;;  %p132_p8 = scmp.lt.s32.totalorder %s402_s10, 1  ;;  %vm175_vm0 = vcmask 392192  }
  0x30   : > { %143 = vxpose.xlu0.b32.start [1/6] (short) (narrow) %v137_v0, 64  ;;  %v139_v2 = vld [vmem:[%s113_s20 + $0x10] sm:$0xff]  ;;  %v140_v3 = vld [vmem:[%s113_s20 + $0x18] sm:$0xff]  ;;  %v141_v4 = vld [vmem:[%s113_s20 + $0x20] sm:$0xff] }
  0x31   : > { %v142_v5 = vld [vmem:[%s113_s20 + $0x28] sm:$0xff]  ;;  %s504_s10 = smov (!%p132_p8, %s402_s10), 1 }
  0x32   : > { %s260_s9 = sshll.u32 %s504_s10, 6 }
  0x33   : > { %s136_s21 = scalar_lea.vmem %s493_s1, %s260_s9 }
  0x34   : > { %144 = vxpose.xlu0.b32.cont [2/6] (short) (narrow) %v138_v1, 64 }
  0x38   : > { %145 = vxpose.xlu0.b32.cont [3/6] (short) (narrow) %v139_v2, 64 }
  0x3c   : > { %146 = vxpose.xlu0.b32.cont [4/6] (short) (narrow) %v140_v3, 64 }
  0x40   : > { %147 = vxpose.xlu0.b32.cont [5/6] (short) (narrow) %v141_v4, 64 }
  0x44   : > { %148 = vxpose.xlu0.b32.end [6/6] (short) (narrow) %v142_v5, 64 }
  0xac   : > { %v159_v6 = vpop.trf.xlu0 }
  0xad   : > { %176 = vst.msk [vmem:[%s136_s21] sm:$0xff] %vm175_vm0, %v159_v6 }
  0xb0   : > { %v160_v7 = vpop.trf.xlu0 }
  0xb1   : > { %177 = vst.msk [vmem:[%s136_s21 + $0x8] sm:$0xff] %vm175_vm0, %v160_v7 }
  0xb4   : > { %v161_v8 = vpop.trf.xlu0 }
  0xb5   : > { %178 = vst.msk [vmem:[%s136_s21 + $0x10] sm:$0xff] %vm175_vm0, %v161_v8 }
  0xb8   : > { %v162_v9 = vpop.trf.xlu0 }
  0xb9   : > { %179 = vst.msk [vmem:[%s136_s21 + $0x18] sm:$0xff] %vm175_vm0, %v162_v9 }
  0xbc   : > { %v163_v10 = vpop.trf.xlu0 }
  0xbd   : > { %180 = vst.msk [vmem:[%s136_s21 + $0x20] sm:$0xff] %vm175_vm0, %v163_v10 }
  0xc0   : > { %v164_v11 = vpop.trf.xlu0 }
  0xc1   : > { %181 = vst.msk [vmem:[%s136_s21 + $0x28] sm:$0xff] %vm175_vm0, %v164_v11 }
  0xc4   : > { %v165_v12 = vpop.trf.xlu0 }
  0xc5   : > { %182 = vst.msk [vmem:[%s136_s21 + $0x30] sm:$0xff] %vm175_vm0, %v165_v12 }
  0xc8   : > { %v166_v13 = vpop.trf.xlu0 }
  0xc9   : > { %183 = vst.msk [vmem:[%s136_s21 + $0x38] sm:$0xff] %vm175_vm0, %v166_v13 }
  0xca PF: > { %p11_p9 = scmp.ge.s32.totalorder %s405_s11, 4   ;;  %s499_s6 = smov %s360_s7 }
  0xcb   : > { %s500_s7 = smov %s364_s8  ;;  %s501_s8 = smov %s415_s14 }
  0xcc   : > { %s502_s9 = smov %s405_s11  ;;  %13 = sbr.rel (!%p11_p9) target bundleno = 3 (0x3), region = 64 }
  0xd1   :  { %205 = vsyncpa [#allocation3], 1 }
  0xd2   :  { %207 = vsyncpa [#allocation3 + $0x1], 1 }

</bundles_post_ra>
